<compile_context>
chip_gen: v7x
topology: tpu7x:2x2x1
jax: 0.10.0
libtpu: 0.0.40
codegen_flags: <defaults>
</compile_context>

<pallas_src>
import jax
import jax.numpy as jnp
from jax.experimental import pallas as pl
from jax.experimental.pallas import tpu as pltpu


def _round_up(n, m):
    return ((n + m - 1) // m) * m


def mlp_kernel(x_ref, w1_ref, b1_ref, w2_ref, b2_ref, o_ref):
    # Hidden layer: (tb, D) @ (D, H_pad), bf16 operands, f32 MXU accumulate.
    h = jnp.dot(x_ref[...], w1_ref[...], preferred_element_type=jnp.float32)
    # Bias + ReLU in f32 on the VPU.
    h = jnp.maximum(h + b1_ref[...], 0.0)
    # TODO(synk): Dropout(0.2) is identity in inference mode; training-mode
    # dropout (stateful PRNG masking) is intentionally not implemented.
    # Output layer: (tb, H_pad) @ (H_pad, 128) on the MXU; keep only the O
    # real lanes for the HBM writeback (masked narrow vst -- store slot has
    # huge slack in this mem-bound kernel).
    out = jnp.dot(h.astype(jnp.bfloat16), w2_ref[...],
                  preferred_element_type=jnp.float32)
    o = o_ref.shape[-1]
    o_ref[...] = (out[:, :o] + b2_ref[...]).astype(o_ref.dtype)


def prepare_params(w1, b1, w2, b2):
    """One-time parameter prep (call at init, NOT per forward call).

    Pads the hidden dim to a 128-lane multiple, casts weights to bf16 for the
    MXU, keeps biases f32.  Padded hidden units get b1=0 -> ReLU(0)=0 and zero
    w2 rows, so the padding contributes nothing to the real outputs.
    """
    D, H = w1.shape
    O = w2.shape[1]
    H_pad = _round_up(H, 128)
    O_pad = _round_up(O, 128)  # MXU operand alignment only; output stays O-wide
    w1_p = jnp.pad(w1, ((0, 0), (0, H_pad - H))).astype(jnp.bfloat16)
    b1_p = jnp.pad(b1.astype(jnp.float32), ((0, 0), (0, H_pad - H)))
    w2_p = jnp.pad(w2, ((0, H_pad - H), (0, O_pad - O))).astype(jnp.bfloat16)
    b2_p = b2.astype(jnp.float32)  # (1, O), unpadded
    return w1_p, b1_p, w2_p, b2_p


def spam_detector_forward(x, params, *, block_b=1024):
    """x: (B, input_size); params: output of prepare_params().

    Returns (B, 2) float32 logits / q-values (eval-mode forward).
    """
    w1_p, b1_p, w2_p, b2_p = params
    B, D = x.shape
    H_pad = w1_p.shape[1]
    O_pad = w2_p.shape[1]
    O = b2_p.shape[1]

    # x.float() semantics, then bf16 MXU feed -> halves the dominant HBM read.
    # (Documented deviation from exact f32: a few mantissa bits of the inputs.)
    x_bf = x.astype(jnp.bfloat16)

    # Batch tile: multiple of 8, capped by the batch; no padding of B -- the
    # grid uses cdiv with a partial tail block (OOB rows masked on store).
    tb = min(_round_up(block_b, 8), _round_up(B, 8))
    if B >= 16 and (B + tb - 1) // tb < 2:
        # v7x megacore: guarantee >= 2 grid steps so both TensorCores get work.
        tb = _round_up((B + 1) // 2, 8)
    grid = (B + tb - 1) // tb

    # NOTE: D (input_size) is small here, so w1 is a single resident block.
    # If input_size grows to a real vocab (10k-100k features), tile the
    # contraction: add an "arbitrary" grid axis over D (block (tD, H_pad)),
    # accumulate in a f32 VMEM scratch with pl.when init/finalize, and size tD
    # so 2x(tD*H_pad bf16 + tb*tD bf16) buffers stay well under the scoped
    # VMEM limit (v7x: 64 MiB physical / 32 MiB default; v5e: 16 MiB default),
    # raising vmem_limit_bytes explicitly if needed.

    flops = 2 * B * (D * H_pad + H_pad * O_pad)
    bytes_accessed = (
        B * D * 2              # x (bf16)
        + D * H_pad * 2        # w1 (bf16)
        + H_pad * 4            # b1 (f32)
        + H_pad * O_pad * 2    # w2 (bf16)
        + O * 4                # b2 (f32)
        + B * O * 4            # out (f32, only real lanes)
    )

    out = pl.pallas_call(
        mlp_kernel,
        out_shape=jax.ShapeDtypeStruct((B, O), jnp.float32),
        grid_spec=pltpu.PrefetchScalarGridSpec(
            num_scalar_prefetch=0,
            grid=(grid,),
            in_specs=[
                pl.BlockSpec((tb, D), lambda i: (i, 0)),        # x: tiled over batch
                pl.BlockSpec((D, H_pad), lambda i: (0, 0)),     # w1: resident
                pl.BlockSpec((1, H_pad), lambda i: (0, 0)),     # b1: resident
                pl.BlockSpec((H_pad, O_pad), lambda i: (0, 0)), # w2: resident
                pl.BlockSpec((1, O), lambda i: (0, 0)),         # b2: resident
            ],
            out_specs=pl.BlockSpec((tb, O), lambda i: (i, 0)),
        ),
        compiler_params=pltpu.CompilerParams(
            dimension_semantics=("parallel",),
        ),
        cost_estimate=pl.CostEstimate(
            flops=flops, transcendentals=0, bytes_accessed=bytes_accessed),
    )(x_bf, w1_p, b1_p, w2_p, b2_p)

    return out


def init_params(key, input_size, hidden_size):
    """Deterministic init mimicking nn.Linear's U(-1/sqrt(fan_in), 1/sqrt(fan_in))."""
    k1, k2, k3, k4 = jax.random.split(key, 4)
    bound1 = 1.0 / jnp.sqrt(jnp.float32(input_size))
    bound2 = 1.0 / jnp.sqrt(jnp.float32(hidden_size))
    # Stored as (in, out) so the kernel computes x @ W (== PyTorch x @ W.T).
    w1 = jax.random.uniform(k1, (input_size, hidden_size), jnp.float32, -bound1, bound1)
    b1 = jax.random.uniform(k2, (1, hidden_size), jnp.float32, -bound1, bound1)
    w2 = jax.random.uniform(k3, (hidden_size, 2), jnp.float32, -bound2, bound2)
    b2 = jax.random.uniform(k4, (1, 2), jnp.float32, -bound2, bound2)
    return w1, b1, w2, b2


if __name__ == "__main__":
    INPUT_SIZE = 32
    HIDDEN_SIZE = 32
    BATCH = 24  # exercises the 2-step grid and a partial tail block

    key = jax.random.PRNGKey(0)
    kx, kp = jax.random.split(key)
    x = jax.random.normal(kx, (BATCH, INPUT_SIZE), jnp.float32)
    w1, b1, w2, b2 = init_params(kp, INPUT_SIZE, HIDDEN_SIZE)

    # One-time parameter prep (hoisted out of the forward hot path).
    params = prepare_params(w1, b1, w2, b2)

    q_values = spam_detector_forward(x, params)
    jax.block_until_ready(q_values)
    assert q_values.shape == (BATCH, 2)

    # Tight check vs. a reference that emulates the kernel's bf16 rounding
    # (bf16 operands, f32 accumulation), so only MXU accumulation-order
    # differences remain.
    def bf16_round(a):
        return a.astype(jnp.bfloat16).astype(jnp.float32)

    h_ref = jnp.maximum(bf16_round(x) @ bf16_round(w1) + b1, 0.0)
    ref_bf16 = bf16_round(h_ref) @ bf16_round(w2) + b2
    assert jnp.allclose(q_values, ref_bf16, atol=1e-3, rtol=1e-3)

    # Loose check vs. the exact f32 eval-mode PyTorch semantics (bf16 feeds
    # trade a few mantissa bits for halved DMA bytes).
    ref_f32 = jnp.maximum(x @ w1 + b1, 0.0) @ w2 + b2
    assert jnp.allclose(q_values, ref_f32, atol=5e-2, rtol=5e-2)

    # `act()` equivalent: argmax over the 2 q-values of the first sample.
    _action = int(jnp.argmax(q_values, axis=1)[0])

    print("KERNEL_OK")
</pallas_src>

<mosaic_0001>
module attributes {stable_mosaic.version = 11 : i64} {
  func.func @mlp_kernel(%arg0: i32, %arg1: memref<16x32xbf16, #tpu.memory_space<vmem>>, %arg2: memref<32x128xbf16, #tpu.memory_space<vmem>>, %arg3: memref<1x128xf32, #tpu.memory_space<vmem>>, %arg4: memref<128x128xbf16, #tpu.memory_space<vmem>>, %arg5: memref<1x2xf32, #tpu.memory_space<vmem>>, %arg6: memref<16x2xf32, #tpu.memory_space<vmem>>) attributes {dimension_semantics = [#tpu.dimension_semantics<parallel>], iteration_bounds = array<i64: 2>, scalar_prefetch = 0 : i64, scratch_operands = 0 : i64, tpu.core_type = #tpu.core_type<tc>, window_params = [{transform_indices = @transform_0, window_bounds = array<i64: 16, 32>}, {pipeline_mode = #tpu.pipeline_mode<synchronous>, transform_indices = @transform_1, window_bounds = array<i64: 32, 128>}, {pipeline_mode = #tpu.pipeline_mode<synchronous>, transform_indices = @transform_2, window_bounds = array<i64: 1, 128>}, {pipeline_mode = #tpu.pipeline_mode<synchronous>, transform_indices = @transform_3, window_bounds = array<i64: 128, 128>}, {pipeline_mode = #tpu.pipeline_mode<synchronous>, transform_indices = @transform_4, window_bounds = array<i64: 1, 2>}, {transform_indices = @transform_5, window_bounds = array<i64: 16, 2>}]} {
    %c0 = arith.constant 0 : index
    %c0_0 = arith.constant 0 : index
    %0 = vector.load %arg1[%c0, %c0_0] : memref<16x32xbf16, #tpu.memory_space<vmem>>, vector<16x32xbf16>
    %c0_1 = arith.constant 0 : index
    %c0_2 = arith.constant 0 : index
    %1 = vector.load %arg2[%c0_1, %c0_2] : memref<32x128xbf16, #tpu.memory_space<vmem>>, vector<32x128xbf16>
    %cst = arith.constant dense<0.000000e+00> : vector<16x128xf32>
    %2 = tpu.matmul %0, %1, %cst {dimension_numbers = #tpu.dot_dimension_numbers<[1], [0], [0], [1], [0, 0, 1, 1], [], []>} : vector<16x32xbf16>, vector<32x128xbf16>, vector<16x128xf32> -> vector<16x128xf32>
    %c0_3 = arith.constant 0 : index
    %c0_4 = arith.constant 0 : index
    %3 = vector.load %arg3[%c0_3, %c0_4] : memref<1x128xf32, #tpu.memory_space<vmem>>, vector<1x128xf32>
    %4 = vector.broadcast %3 : vector<1x128xf32> to vector<16x128xf32>
    %5 = arith.addf %2, %4 : vector<16x128xf32>
    %cst_5 = arith.constant 0.000000e+00 : f32
    %6 = vector.broadcast %cst_5 : f32 to vector<16x128xf32>
    %7 = arith.maximumf %5, %6 : vector<16x128xf32>
    %8 = arith.truncf %7 : vector<16x128xf32> to vector<16x128xbf16>
    %c0_6 = arith.constant 0 : index
    %c0_7 = arith.constant 0 : index
    %9 = vector.load %arg4[%c0_6, %c0_7] : memref<128x128xbf16, #tpu.memory_space<vmem>>, vector<128x128xbf16>
    %cst_8 = arith.constant dense<0.000000e+00> : vector<16x128xf32>
    %10 = tpu.matmul %8, %9, %cst_8 {dimension_numbers = #tpu.dot_dimension_numbers<[1], [0], [0], [1], [0, 0, 1, 1], [], []>} : vector<16x128xbf16>, vector<128x128xbf16>, vector<16x128xf32> -> vector<16x128xf32>
    %11 = vector.extract_strided_slice %10 {offsets = [0, 0], sizes = [16, 2], strides = [1, 1]} : vector<16x128xf32> to vector<16x2xf32>
    %c0_9 = arith.constant 0 : index
    %c0_10 = arith.constant 0 : index
    %12 = vector.load %arg5[%c0_9, %c0_10] : memref<1x2xf32, #tpu.memory_space<vmem>>, vector<1x2xf32>
    %13 = vector.broadcast %12 : vector<1x2xf32> to vector<16x2xf32>
    %14 = arith.addf %11, %13 : vector<16x2xf32>
    %c0_11 = arith.constant 0 : index
    %c0_12 = arith.constant 0 : index
    %15 = vector.load %arg6[%c0_11, %c0_12] : memref<16x2xf32, #tpu.memory_space<vmem>>, vector<16x2xf32>
    tpu.vector_store %arg6[%c0_11, %c0_12], %14 {strides = array<i32>} : memref<16x2xf32, #tpu.memory_space<vmem>>, vector<16x2xf32>,
    return
  }
  func.func @transform_0(%arg0: i32) -> (i32, i32) {
    %c0_i32 = arith.constant 0 : i32
    %c0_i32_0 = arith.constant 0 : i32
    return %arg0, %c0_i32 : i32, i32
  }
  func.func @transform_1(%arg0: i32) -> (i32, i32) {
    %c0_i32 = arith.constant 0 : i32
    %c0_i32_0 = arith.constant 0 : i32
    %c0_i32_1 = arith.constant 0 : i32
    return %c0_i32, %c0_i32_0 : i32, i32
  }
  func.func @transform_2(%arg0: i32) -> (i32, i32) {
    %c0_i32 = arith.constant 0 : i32
    %c0_i32_0 = arith.constant 0 : i32
    %c0_i32_1 = arith.constant 0 : i32
    return %c0_i32, %c0_i32_0 : i32, i32
  }
  func.func @transform_3(%arg0: i32) -> (i32, i32) {
    %c0_i32 = arith.constant 0 : i32
    %c0_i32_0 = arith.constant 0 : i32
    %c0_i32_1 = arith.constant 0 : i32
    return %c0_i32, %c0_i32_0 : i32, i32
  }
  func.func @transform_4(%arg0: i32) -> (i32, i32) {
    %c0_i32 = arith.constant 0 : i32
    %c0_i32_0 = arith.constant 0 : i32
    %c0_i32_1 = arith.constant 0 : i32
    return %c0_i32, %c0_i32_0 : i32, i32
  }
  func.func @transform_5(%arg0: i32) -> (i32, i32) {
    %c0_i32 = arith.constant 0 : i32
    %c0_i32_0 = arith.constant 0 : i32
    return %arg0, %c0_i32 : i32, i32
  }
}

</mosaic_0001>

<bundles_post_ra>
// kernel: tpu_custom_call.1
= control target key start
LH: loop header
LB: loop body
LE: loop exit
PB: predicated region body
PF: predicated region fallthrough
CT: control target
= control target key end

     0   :  { %10 = vsyncpa [#allocation3], 0  ;;  %s1411_s0 = inlined_call_operand.hbm [shape: bf16[24,32], index: 0, kind: input, shape index: {}]   ;;  %s1412_s1 = inlined_call_operand.hbm [shape: bf16[32,128], index: 1, kind: input, shape index: {}]   ;;  %s1413_s2 = inlined_call_operand.vmem [shape: f32[1,128], index: 2, kind: input, shape index: {}]   ;;  %s1414_s3 = inlined_call_operand.hbm [shape: bf16[128,128], index: 3, kind: input, shape index: {}]   ;;  %s1415_s4 = inlined_call_operand.vmem [shape: f32[1,2], index: 4, kind: input, shape index: {}]   ;;  %s1416_s5 = inlined_call_operand.vmem [shape: f32[24,2], index: 5, kind: output, shape index: {}]  }
   0x1   :  { %12 = vsyncpa [#allocation3 + $0x1], 0 }
   0x2   :  { %13 = vsyncpa [#allocation5], 0  ;;  %s1183_s18 = smov 0   ;;  %s1185_s19 = smov 0  }
   0x3   :  { %s1187_s20 = smov 0   ;;  %s1189_s21 = smov 0  }
   0x4 LB: > { %s1202_s22 = sadd.s32 4294967295, %s1110_s21   ;;  %s1205_s23 = sadd.s32 1, %s1110_s21   ;;  %s1110_s21 = sphi %s1189_s21, %s1434_s21   ;;  %s1106_s20 = sphi %s1187_s20, %s1433_s20   ;;  %s1102_s19 = sphi %s1185_s19, %s1432_s19   ;;  %s1098_s18 = sphi %s1183_s18, %s1431_s18  }
   0x5   : > { %s23_s24 = ssub.s32 %s1110_s21, %s1205_s23  ;;  %s26_s25 = sadd.s32 1, %s1106_s20 }
   0x6   : > { %p24_p0 = scmp.eq.s32.totalorder %s23_s24, 0  ;;  %p33_p1 = scmp.ne.s32.totalorder %s1106_s20, %s1102_s19 }
   0x7   : > { %p34_p2 = scmp.eq.s32.totalorder %s1110_s21, 0  ;;  %p39_p3 = scmp.ne.s32.totalorder %s1102_s19, %s1098_s18 }
   0x8   : > { %s1215_s26 = scalar_select %p24_p0, %s1106_s20, %s26_s25  }
   0x9   : > { %p1217_p4 = por %p34_p2, %p33_p1  ;;  %p1417_p5 = scmp.eq.s32.totalorder %s1202_s22, 0 }
   0xa   : > { %p147_p6 = scmp.eq.s32.totalorder %s1202_s22, 1  ;;  %p730_p7 = scmp.ge.s32.totalorder %s1110_s21, 1 }
   0xb   : > { %s1420_s27 = scalar_select %p1217_p4, 1, 0 }
   0xc   : > { %p1226_p8 = por %p1417_p5, %p39_p3  ;;  %p160_p9 = scmp.lt.s32.totalorder %s1110_s21, 3 }
   0xd   : > { %p1231_p10 = por %p147_p6, %p33_p1  ;;  %s1144_s6 = smov [#allocation4]  }
   0xe   : > { %s1421_s28 = scalar_select %p1226_p8, 1, 0 }
   0xf   : > { %s1422_s29 = scalar_select %p1231_p10, 1, 0 }
  0x10   : > { %p1235_p11 = pnand %p730_p7, %p160_p9  ;;  %s172_s7 = sshll.u32 %s1144_s6, 4  ;;  %s173_s7 = int_to_ptr.vmem [resolvable:$true] %s172_s7 }
  0x11   : > { %s1145_s9 = smov [#allocation6]   ;;  %s956_s13 = scalar_lea.hbm %s1412_s1, 256 }
  0x12   : > { %s1423_s30 = scalar_select %p1235_p11, 1, 0 }
  0x13   : > { %p830_p12 = pneg %p1235_p11  ;;  %s188_s10 = sshll.u32 %s1145_s9, 4  ;;  %s1247_s10 = int_to_ptr.vmem [resolvable:$true] %s188_s10 }
  0x14   : > { %p957_p0 = scmp.ne.s32.totalorder %s1412_s1, %s956_s13  ;;  %p963_p6 = scmp.lt.u32.totalorder %s956_s13, %s1412_s1 }
  0x15   : > { %p1243_p13 = pnand %p830_p12, %p1417_p5 }
  0x17   : > { %p958_p1 = pneg %p1243_p13 }
  0x19   : > { %p959_p2 = pnand %p958_p1, %p957_p0 }
  0x1b   : > { %p960_p3 = pneg %p959_p2 }
  0x1d   : > { %p965_p7 = pnand %p963_p6, %p960_p3 }
  0x1f   : > { %968 = shalt.err (!%p965_p7)
}
  0x20   : > { %s969_s18 = scalar_lea.vmem %s173_s7, 256  ;;  %p977_p10 = scmp.lt.s32.totalorder %s173_s7, %s173_s7 }
  0x21   : > { %p970_p9 = scmp.ne.s32.totalorder %s173_s7, %s969_s18  ;;  %p978_p8 = scmp.lt.s32.totalorder %s969_s18, %s969_s18 }
  0x23   : > { %p972_p12 = pnand %p970_p9, %p958_p1  ;;  %p979_p11 = por %p978_p8, %p977_p10 }
  0x25   : > { %p973_p5 = pneg %p972_p12 }
  0x27   : > { %p980_p4 = pnand %p979_p11, %p973_p5 }
  0x29   : > { %983 = shalt.err (!%p980_p4)
}
  0x2a   : > { %s1146_s24 = smov 64   ;;  %s1147_s25 = smov 4  }
  0x2b   : > { %833 = dma.hbm_to_vmem [thread:$0]  (!%p1243_p13), %s1412_s1, 256, %s173_s7, [#allocation5], %s1146_s24, %s1146_s24, %s1147_s25  }
  0x2c   : > { %s984_s13 = scalar_lea.hbm %s1414_s3, 1024 }
  0x2d   : > { %p985_p0 = scmp.ne.s32.totalorder %s1414_s3, %s984_s13  ;;  %p991_p8 = scmp.lt.u32.totalorder %s984_s13, %s1414_s3 }
  0x2f   : > { %p987_p4 = pnand %p985_p0, %p958_p1 }
  0x31   : > { %p988_p5 = pneg %p987_p4 }
  0x33   : > { %p993_p10 = pnand %p991_p8, %p988_p5 }
  0x35   : > { %996 = shalt.err (!%p993_p10)
}
  0x36   : > { %s997_s7 = scalar_lea.vmem %s1247_s10, 1024  ;;  %p1005_p6 = scmp.lt.s32.totalorder %s1247_s10, %s1247_s10 }
  0x37   : > { %p998_p11 = scmp.ne.s32.totalorder %s1247_s10, %s997_s7  ;;  %p1006_p7 = scmp.lt.s32.totalorder %s997_s7, %s997_s7 }
  0x39   : > { %p1000_p2 = pnand %p998_p11, %p958_p1  ;;  %p1007_p9 = por %p1006_p7, %p1005_p6 }
  0x3b   : > { %p1001_p3 = pneg %p1000_p2 }
  0x3d   : > { %p1008_p12 = pnand %p1007_p9, %p1001_p3 }
  0x3f   : > { %1011 = shalt.err (!%p1008_p12)
}
  0x40   : > { %836 = dma.hbm_to_vmem [thread:$0]  (!%p1243_p13), %s1414_s3, 1024, %s1247_s10, [#allocation5], %s1146_s24, %s1146_s24, %s1147_s25  }
  0x41   : > { %p733_p0 = scmp.ge.s32.totalorder %s1110_s21, 2 }
  0x42   : > { %p1425_p4 = scmp.ne.s32.totalorder (!%p733_p0), %s1420_s27, 0 }
  0x43   : > { %201 = sbr.rel (%p733_p0) target bundleno = 109 (0x6d), region = 32 }
  0x4a   : > { %204 = sbr.rel (!%p1425_p4) target bundleno = 109 (0x6d), region = 36  ;;  %s205_s9 = sand.u32 (%p1425_p4), 1, %s1106_s20  }
  0x4b   : > { %s735_s11 = sshll.u32 (%p1425_p4), %s1110_s21, 1  ;;  %s734_s12 = sshll.u32 (%p1425_p4), %s205_s9, 3 }
  0x4c   : > { %s211_s13 = ssub.s32 (%p1425_p4), 3, %s735_s11  ;;  %s1304_s15 = scalar_lea.sflag (%p1425_p4), [#allocation3], %s205_s9 }
  0x4d   : > { %p212_p1 = scmp.lt.s32.totalorder (%p1425_p4), %s211_s13, 2  ;;  %s209_s10 = scalar_lea.vmem (%p1425_p4), [#allocation2], %s734_s12 }
  0x51   : > { %s1436_s13 = smov (!%p212_p1, %s211_s13), 2 }
  0x52   : > { %s1301_s8 = sshll.u32 %s1436_s13, 6 }
  0x53   : > { %s216_s14 = ssub.s32 128, %s1301_s8 }
  0x54   : > { %217 = vsyncadd %s1304_s15, %s216_s14  ;;  %p737_p13 = scmp.ne.s32.totalorder %s1301_s8, 0  ;;  %s777_s27 = sshll.u32 %s1110_s21, 7 }
  0x55   : > { %s1312_s16 = scalar_lea.hbm %s1411_s0, %s777_s27  ;;  %s222_s17 = sshll.u32 %s209_s10, 4  ;;  %s1314_s17 = int_to_ptr.vmem [resolvable:$true] %s222_s17 }
  0x56   : > { %s1012_s7 = scalar_lea.hbm %s1312_s16, %s1301_s8  ;;  %s1016_s21 = scalar_lea.hbm %s1411_s0, 192 }
  0x57   : > { %p1013_p5 = scmp.ne.s32.totalorder %s1312_s16, %s1012_s7  ;;  %p1017_p11 = scmp.lt.u32.totalorder %s1312_s16, %s1411_s0 }
  0x58   : > { %p1018_p2 = scmp.lt.u32.totalorder %s1016_s21, %s1012_s7  ;;  %p1020_p6 = scmp.lt.u32.totalorder %s1012_s7, %s1312_s16 }
  0x59   : > { %p1014_p8 = pnand %p1013_p5, %p737_p13 }
  0x5a   : > { %p1019_p3 = por %p1018_p2, %p1017_p11 }
  0x5b   : > { %p1015_p10 = pneg %p1014_p8 }
  0x5c   : > { %p1021_p7 = por %p1020_p6, %p1019_p3 }
  0x5e   : > { %p1022_p9 = pnand %p1021_p7, %p1015_p10 }
  0x60   : > { %1025 = shalt.err (!%p1022_p9)
}
  0x61   : > { %s1026_s12 = scalar_lea.vmem %s1314_s17, %s1301_s8  ;;  %s1148_s13 = smov [#allocation2]  }
  0x62   : > { %p1027_p12 = scmp.ne.s32.totalorder %s1314_s17, %s1026_s12  ;;  %s1030_s14 = sshll.u32 %s1148_s13, 4  ;;  %s1031_s14 = int_to_ptr.vmem [resolvable:$false] %s1030_s14 }
  0x63   : > { %s1032_s10 = scalar_lea.vmem %s1031_s14, 256  ;;  %p1033_p1 = scmp.lt.s32.totalorder %s1314_s17, %s1031_s14 }
  0x64   : > { %p1028_p0 = pnand %p1027_p12, %p737_p13  ;;  %p1034_p5 = scmp.lt.s32.totalorder %s1032_s10, %s1026_s12 }
  0x66   : > { %p1029_p4 = pneg %p1028_p0  ;;  %p1035_p8 = por %p1034_p5, %p1033_p1 }
  0x68   : > { %p1036_p11 = pnand %p1035_p8, %p1029_p4 }
  0x6a   : > { %1039 = shalt.err (!%p1036_p11)
}
  0x6b   : > { %s1149_s27 = smov 64   ;;  %s1150_s24 = smov 4  }
  0x6c   : > { %228 = dma.hbm_to_vmem [thread:$0]  (%p737_p13), %s1312_s16, %s1301_s8, %s1314_s17, %s1304_s15, %s1149_s27, %s1149_s27, %s1150_s24  }
  0x6d PF: > { %p1426_p10 = scmp.ne.s32.totalorder %s1423_s30, 0 }
  0x6e   : > { %s1344_s25 = sand.u32 (!%p1426_p10), 1, %s1102_s19   ;;  %p1427_p2 = scmp.ne.s32.totalorder (!%p1426_p10), %s1421_s28, 0 }
  0x6f   : > { %234 = sbr.rel (%p1426_p10) target bundleno = 618 (0x26a), region = 40  ;;  %s742_s7 = sshll.u32 (!%p1426_p10), %s1344_s25, 3 }
  0x70   : > { %s237_s18 = scalar_lea.sflag (!%p1426_p10), [#allocation3], %s1344_s25  ;;  %s240_s6 = scalar_lea.vmem (!%p1426_p10), [#allocation2], %s742_s7 }
  0x76   : > { %1089 = dma.done.wait (%p1427_p2), %s237_s18, 128  }
  0x77   : > { %1091 = vsyncadd (%p1427_p2), %s237_s18, 4294967168  ;;  %p1428_p13 = scmp.eq.s32.totalorder %s1202_s22, 0 }
  0x79   : > { %1093 = dma.done.wait (%p1428_p13), [#allocation5], 1280   ;;  %p1429_p3 = pmov %p1428_p13 }
  0x7a   : > { %v1151_v0 = vmov 0.0   ;;  %vm1152_vm0 = vmmov 0   ;;  %v945_v1 = vld [vmem:[#allocation4] sm:$0xff]   ;;  %v946_v2 = vld [vmem:[#allocation4 + $0x8] sm:$0xff]   ;;  %v948_v3 = vld [vmem:[#allocation6] sm:$0xff]   ;;  %vm315_vm1 = vcmask 261120  }
  0x7b   : > { %1095 = vsyncadd (%p1429_p3), [#allocation5], 4294966016  ;;  %793 = vmatprep.subr.bf16.mxu0 %v1151_v0  ;;  %797 = vmatprep.mubr.msk.bf16.mxu0 %vm1152_vm0, %v1151_v0  ;;  %v947_v4 = vld [vmem:[%s240_s6] sm:$0xff]   ;;  %v950_v6 = vld [vmem:[#allocation6 + $0x10] sm:$0xff]   ;;  %s745_s8 = sshll.u32 %s1344_s25, 4  ;;  %vm477_vm2 = vcmask 15360  }
  0x7c   : > { %801 = vmatprep.subr.bf16.mxu1 %v1151_v0  ;;  %817 = vmatprep.mubr.msk.bf16.mxu1 %vm1152_vm0, %v1151_v0  ;;  %v949_v5 = vld [vmem:[#allocation6 + $0x8] sm:$0xff]   ;;  %v951_v7 = vld [vmem:[#allocation6 + $0x18] sm:$0xff]   ;;  %v952_v8 = vld [vmem:[#allocation6 + $0x20] sm:$0xff]   ;;  %s1363_s17 = scalar_lea.vmem [#allocation7], %s745_s8   ;;  %p1430_p6 = scmp.ne.s32.totalorder %s1422_s29, 0 }
  0x7d   : > { %794 = vmatpush3.bf16.msra.mxu0 %v945_v1  ;;  %802 = vmatpush3.bf16.msra.mxu1 %v948_v3  ;;  %v953_v9 = vld [vmem:[#allocation6 + $0x28] sm:$0xff]   ;;  %v954_v10 = vld [vmem:[#allocation6 + $0x30] sm:$0xff]   ;;  %v955_v11 = vld [vmem:[#allocation6 + $0x38] sm:$0xff]   ;;  %s761_s21 = sshll.u32 (%p1430_p6), %s1202_s22, 1  ;;  %s778_s9 = sshll.u32 (%p1430_p6), %s1202_s22, 4 }
  0x7e   : > { %795 = vmatprep.subr.bf16.mxu0 %v1151_v0  ;;  %803 = vmatprep.subr.bf16.mxu1 %v1151_v0  ;;  %v746_v12 = vld [vmem:[%s1413_s2] ss:$0 sm:$0xff]  ;;  %s488_s11 = ssub.s32 (%p1430_p6), 3, %s761_s21  ;;  %s1374_s14 = scalar_lea.vmem (%p1430_p6), %s1416_s5, %s778_s9  }
  0x7f   : > { %v759_v22 = vld [vmem:[%s1415_s4] ss:$0 sm:$0xff]  ;;  %p489_p7 = scmp.lt.s32.totalorder (%p1430_p6), %s488_s11, 2 }
  0x81   : > { %796 = vmatpush3.bf16.msra.mxu0 %v946_v2  ;;  %804 = vmatpush3.bf16.msra.mxu1 %v949_v5 }
  0x82   : > { %805 = vmatprep.subr.bf16.mxu1 %v1151_v0 }
  0x84   : > { %798 = vmatmul.mubr.msk.bf16.vlgmr.msra.gmra.mrb[0].mxu0 %vm315_vm1, %v947_v4 }
  0x85   : > { %806 = vmatpush3.bf16.msra.mxu1 %v950_v6 }
  0x86   : > { %807 = vmatprep.subr.bf16.mxu1 %v1151_v0 }
  0x89   : > { %808 = vmatpush3.bf16.msra.mxu1 %v951_v7 }
  0x8a   : > { %809 = vmatprep.subr.bf16.mxu1 %v1151_v0 }
  0x8d   : > { %810 = vmatpush3.bf16.msra.mxu1 %v952_v8 }
  0x8e   : > { %811 = vmatprep.subr.bf16.mxu1 %v1151_v0 }
  0x91   : > { %812 = vmatpush3.bf16.msra.mxu1 %v953_v9 }
  0x92   : > { %813 = vmatprep.subr.bf16.mxu1 %v1151_v0 }
  0x95   : > { %814 = vmatpush3.bf16.msra.mxu1 %v954_v10 }
  0x96   : > { %815 = vmatprep.subr.bf16.mxu1 %v1151_v0 }
  0x99   : > { %816 = vmatpush3.bf16.msra.mxu1 %v955_v11 }
 0x157   : > { %v353_v13 = vpop.f32.mrb[0].mxu0 }
 0x158   : > { %v354_v14 = vadd.f32 %v746_v12, %v353_v13  ;;  %v799_v15 = vpop.f32.mrb[1].mxu0 }
 0x159   : > { %v356_v16 = vpop.f32.mrb[2].mxu0 }
 0x15a   : > { %v357_v17 = vadd.f32 %v746_v12, %v356_v16  ;;  %v800_v18 = vpop.f32.mrb[3].mxu0  ;;  %v360_v19 = vmax.f32 %v354_v14, 0.0 }
 0x15c   : > { %v361_v20 = vmax.f32 %v357_v17, 0.0 }
 0x15e   : > { %v362_v21 = vpack.c.bf16 %v361_v20, %v360_v19 }
 0x160   : > { %818 = vmatmul.mubr.bf16.vlgmr.msra.gmra.mrb[0].mxu1 %v362_v21 }
 0x232   : > { %486 = sbr.rel (!%p1430_p6) target bundleno = 618 (0x26a), region = 56 }
 0x233   : > { %v461_v23 = vpop.f32.mrb[0].mxu1 }
 0x234   : > { %v475_v24 = vadd.f32 %v759_v22, %v461_v23  ;;  %v819_v25 = vpop.f32.mrb[1].mxu1 }
 0x235   : > { %v464_v26 = vpop.f32.mrb[2].mxu1 }
 0x236   : > { %478 = vst.msk [vmem:[%s1363_s17] sm:$0xff] %vm477_vm2, %v475_v24  ;;  %v476_v27 = vadd.f32 %v759_v22, %v464_v26  ;;  %v820_v28 = vpop.f32.mrb[3].mxu1 }
 0x238   : > { %479 = vst.msk [vmem:[%s1363_s17 + $0x8] sm:$0xff] %vm477_vm2, %v476_v27 }
 0x239   : > { %s1438_s11 = smov (!%p489_p7, %s488_s11), 2 }
 0x23a   : > { %s762_s10 = sshll.u32 %s1438_s11, 7 }
 0x23b   : > { %p765_p9 = scmp.eq.s32.totalorder %s762_s10, 0 }
 0x23c   : > { %s1380_s29 = sshrl.u32 (!%p765_p9), %s1438_s11, 1 }
 0x23d   : > { %497 = sbr.rel (%p765_p9) target bundleno = 618 (0x26a), region = 60  ;;  %p766_p12 = scmp.le.s32.totalorder (!%p765_p9), %s1380_s29, 0 }
 0x244   : > { %664 = sbr.rel (%p766_p12) target bundleno = 597 (0x255), region = 142  ;;  %s1112_s22 = smov (!%p766_p12), %s1374_s14  }
 0x245   : > { %s1116_s27 = smov (!%p766_p12), %s1363_s17   ;;  %s1120_s24 = smov (!%p766_p12), 0  }
 0x246   : > { %s1124_s25 = smov (!%p766_p12), 0  }
 0x24b LB: >> { %v561_v29 = vld [vmem:[%s1118_s27] sm:$0xff]  ;;  %v563_v30 = vld [vmem:[%s1118_s27 + $0x8] sm:$0xff]  ;;  %s565_s7 = sadd.s32 1, %s1122_s24  ;;  %s555_s25 = sadd.s32 1, %s1126_s25   ;;  %s1126_s25 = sphi %s1124_s25, %s555_s25   ;;  %s1122_s24 = sphi %s1120_s24, %s1121_s24   ;;  %s1118_s27 = sphi %s1116_s27, %s570_s27   ;;  %s1114_s22 = sphi %s1112_s22, %s571_s22  }
 0x24c   : >> { %562 = vst [vmem:[%s1114_s22] sm:$0xff] %v561_v29  ;;  %564 = vst [vmem:[%s1114_s22 + $0x8] sm:$0xff] %v563_v30  ;;  %p566_p0 = scmp.ge.s32.totalorder %s565_s7, %s1380_s29  ;;  %p554_p4 = scmp.ge.s32.totalorder %s555_s25, %s1380_s29 }
 0x24e   : >> { %s1440_s7 = smov (%p566_p0, %s565_s7), 0  ;;  %557 = sbr.rel (!%p554_p4) target bundleno = 587 (0x24b), region = 148 }
 0x24f   : >> { %s767_s18 = sshll.u32 %s1440_s7, 4  ;;  %s1121_s24 = smov %s1440_s7  }
 0x250   : >> { %s570_s27 = scalar_lea.vmem %s1363_s17, %s767_s18 [#allocation7]   ;;  %s571_s22 = scalar_lea.vmem %s1374_s14, %s767_s18  }
 0x255 PF: > { %s1390_s6 = sand.u32 1, %s1438_s11   ;;  %s779_s28 = sshll.u32 %s1380_s29, 4 }
 0x256   : > { %s576_s30 = scalar_lea.vmem %s1363_s17, %s779_s28 [#allocation7]   ;;  %s578_s8 = scalar_lea.vmem %s1374_s14, %s779_s28  }
 0x257   : > { %p772_p1 = scmp.le.s32.totalorder %s1390_s6, 0 }
 0x258   : > { %s1128_s15 = smov (!%p772_p1), %s578_s8   ;;  %s1132_s16 = smov (!%p772_p1), %s576_s30  }
 0x259   : > { %678 = sbr.rel (%p772_p1) target bundleno = 618 (0x26a), region = 153  ;;  %s1136_s21 = smov (!%p772_p1), 0  }
 0x25a   : > { %s1140_s9 = smov (!%p772_p1), 0  }
 0x260 LB: >> { %v588_v31 = vld [vmem:[%s1134_s16] sm:$0xff]  ;;  %s590_s11 = sadd.s32 1, %s1138_s21  ;;  %s582_s9 = sadd.s32 1, %s1142_s9   ;;  %s1142_s9 = sphi %s1140_s9, %s582_s9   ;;  %s1138_s21 = sphi %s1136_s21, %s1137_s21   ;;  %s1134_s16 = sphi %s1132_s16, %s595_s16   ;;  %s1130_s15 = sphi %s1128_s15, %s596_s15  }
 0x261   : >> { %589 = vst [vmem:[%s1130_s15] sm:$0xff] %v588_v31  ;;  %p591_p5 = scmp.ge.s32.totalorder %s590_s11, %s1390_s6  ;;  %p581_p8 = scmp.ge.s32.totalorder %s582_s9, %s1390_s6 }
 0x263   : >> { %s1442_s11 = smov (%p591_p5, %s590_s11), 0  ;;  %584 = sbr.rel (!%p581_p8) target bundleno = 608 (0x260), region = 159 }
 0x264   : >> { %s773_s17 = sshll.u32 %s1442_s11, 3  ;;  %s1137_s21 = smov %s1442_s11  }
 0x265   : >> { %s595_s16 = scalar_lea.vmem %s576_s30, %s773_s17 [#allocation7]   ;;  %s596_s15 = scalar_lea.vmem %s578_s8, %s773_s17  }
 0x26a PF: > { %p16_p11 = scmp.ge.s32.totalorder %s1205_s23, 4   ;;  %s1431_s18 = smov %s1102_s19 }
 0x26b   : > { %s1432_s19 = smov %s1106_s20  ;;  %s1433_s20 = smov %s1215_s26 }
 0x26c   : > { %s1434_s21 = smov %s1205_s23  ;;  %18 = sbr.rel (!%p16_p11) target bundleno = 4 (0x4), region = 170 }
 0x273   :  { %612 = vsyncpa [#allocation3], 1 }
 0x274   :  { %614 = vsyncpa [#allocation3 + $0x1], 1 }
 0x275   :  { %615 = vsyncpa [#allocation5], 1 }

</bundles_post_ra>
